<compile_context>
chip_gen: v7x
topology: tpu7x:2x2x1
jax: 0.10.0
libtpu: 0.0.40
codegen_flags: <defaults>
</compile_context>

<pallas_src>
import functools
import math

import jax
import jax.numpy as jnp
from jax.experimental import pallas as pl
from jax.experimental.pallas import tpu as pltpu


def _cdiv(a: int, b: int) -> int:
    return -(-a // b)


@functools.lru_cache(maxsize=None)
def _hw_budgets():
    """Return (per-step block payload target bytes, vmem_limit_bytes) by TPU gen."""
    vmem_cap = 64 * 1024 * 1024  # conservative default (v7x-class)
    try:
        info = pltpu.get_tpu_info()
        vmem_cap = int(getattr(info, "vmem_capacity_bytes", vmem_cap) or vmem_cap)
    except Exception:
        pass
    if vmem_cap >= 96 * 1024 * 1024:
        # v5e / v6e class: 128 MiB VMEM per TC, HBM/DMA-bound -> bigger payload.
        return 4 * 1024 * 1024, 64 * 1024 * 1024
    # v7x class: 64 MiB VMEM per TC -> ~2 MiB blocks, conservative VMEM limit.
    return 2 * 1024 * 1024, 32 * 1024 * 1024


def _even_split_128(dim: int, max_tile: int) -> int:
    """Full dim if it fits max_tile; else near-equal multiples of 128 (min tail)."""
    if dim <= max_tile:
        return dim
    units = _cdiv(dim, 128)
    max_units = max(max_tile // 128, 1)
    n_blocks = _cdiv(units, max_units)
    return _cdiv(units, n_blocks) * 128


def _choose_tiles(S: int, D: int, itemsize: int, budget: int):
    """Pick (ts, td) favoring full-dim (contiguous, unmasked) blocks."""
    # 1) Whole (S, D) slab fits: full-dim blocks on both axes (no remainder
    #    tiles, fully contiguous row reads and writes; batch rows get folded).
    if S * D * itemsize <= budget:
        return S, D
    # 2) Keep D full (every input row is one contiguous HBM read); tile S into
    #    near-equal multiples of 128 (output's last dim stays lane-dense).
    if D * itemsize * 128 <= budget:
        max_ts = (budget // (D * itemsize)) // 128 * 128
        return _even_split_128(S, max_ts), D
    # 3) Keep S full (every output row write is contiguous); tile D.
    if S * itemsize * 128 <= budget:
        max_td = (budget // (S * itemsize)) // 128 * 128
        return S, _even_split_128(D, max_td)
    # 4) Both axes are huge: square-ish 128-multiple tiles within budget.
    side = max(int(math.isqrt(budget // itemsize)) // 128 * 128, 128)
    return _even_split_128(S, side), _even_split_128(D, side)


def _balance_for_two_cores(B: int, bt: int, n_other_steps: int) -> int:
    """Prefer an even total grid-step count so v7x's two TCs split work evenly.

    The total is odd only if both the batch-block count and the other grid
    extents are odd; bumping the batch-block count to the next even value
    (when possible) fixes it at the cost of at most one extra small step.
    """
    if B <= 1 or bt <= 1:
        return bt
    gb = _cdiv(B, bt)
    if (gb * n_other_steps) % 2 == 0:
        return bt
    new_bt = _cdiv(B, gb + 1)
    if new_bt >= 1 and (_cdiv(B, new_bt) * n_other_steps) % 2 == 0:
        return new_bt
    return bt


def _transpose_kernel(x_ref, o_ref):
    # x_ref block: (BT, TS, TD) ; o_ref block: (BT, TD, TS)
    # TODO(synk): if the bundle dump shows Mosaic materializing a VMEM temp for
    # the transposed value, sub-tile this into 128x128 vxpose blocks written
    # straight into o_ref[...] slices to cut the extra in-VMEM pass.
    o_ref[...] = jnp.transpose(x_ref[...], (0, 2, 1))


@functools.lru_cache(maxsize=None)
def _build_transpose_1_2(B: int, S: int, D: int, dtype_name: str):
    dtype = jnp.dtype(dtype_name)
    itemsize = dtype.itemsize
    budget, vmem_limit = _hw_budgets()

    ts, td = _choose_tiles(S, D, itemsize, budget)

    # Fold batch rows into each block when the (ts, td) tile is small, so every
    # grid step moves a useful amount of data (~budget bytes per step).
    block_bytes = max(ts * td * itemsize, 1)
    bt = int(min(B, max(1, budget // block_bytes)))

    gs = _cdiv(S, ts)
    gd = _cdiv(D, td)
    bt = _balance_for_two_cores(B, bt, gs * gd)
    gb = _cdiv(B, bt)

    # Innermost grid axis iterates S-blocks: successive output DMAs land in
    # address-adjacent columns of the (B, D, S) output.
    grid = (gb, gd, gs)

    cost = pl.CostEstimate(
        flops=0,
        transcendentals=0,
        bytes_accessed=2 * B * S * D * itemsize,
    )

    call = pl.pallas_call(
        _transpose_kernel,
        out_shape=jax.ShapeDtypeStruct((B, D, S), dtype),
        grid_spec=pltpu.PrefetchScalarGridSpec(
            num_scalar_prefetch=0,
            grid=grid,
            in_specs=[pl.BlockSpec((bt, ts, td), lambda b, j, i: (b, i, j))],
            out_specs=pl.BlockSpec((bt, td, ts), lambda b, j, i: (b, j, i)),
        ),
        compiler_params=pltpu.CompilerParams(
            dimension_semantics=("parallel", "parallel", "parallel"),
            vmem_limit_bytes=vmem_limit,
        ),
        cost_estimate=cost,
    )
    return jax.jit(call)


def transpose_1_2(x: jax.Array) -> jax.Array:
    """Pallas equivalent of torch.transpose(x, 1, 2).contiguous() for 3-D x."""
    B, S, D = x.shape
    return _build_transpose_1_2(B, S, D, x.dtype.name)(x)


class Transpose:
    """Mirror of the PyTorch `Transpose` module (parameter-free)."""

    def __init__(self, *dims, contiguous: bool = False):
        self.dims = dims
        self.contiguous = contiguous  # no-op in JAX: results are always dense

    def __call__(self, x: jax.Array) -> jax.Array:
        d0, d1 = self.dims
        if x.ndim == 3 and sorted((d0 % x.ndim, d1 % x.ndim)) == [1, 2]:
            return transpose_1_2(x)
        # Fallback for other dim pairs (pure layout op, no hot-path compute).
        perm = list(range(x.ndim))
        perm[d0], perm[d1] = perm[d1], perm[d0]
        return jnp.transpose(x, perm)


if __name__ == "__main__":
    keys = jax.random.split(jax.random.PRNGKey(0), 5)
    mod = Transpose(1, 2, contiguous=True)

    def check(x):
        out = jax.block_until_ready(mod(x))
        ref = jnp.transpose(x, (0, 2, 1))
        assert out.shape == ref.shape and out.dtype == x.dtype
        assert jnp.array_equal(out, ref), f"mismatch for shape {x.shape} {x.dtype}"

    # 1) Small PatchTST-like shape: full (S, D) per block, batch rows folded.
    check(jax.random.normal(keys[0], (2, 8, 32), dtype=jnp.float32))

    # 2) Awkward dims kept full-dim (no masked tails), odd batch boundary block.
    check(jax.random.normal(keys[1], (3, 520, 640), dtype=jnp.float32))

    # 3) Larger slab exercising S-tiling into 128-multiples with full-dim D.
    check(jax.random.normal(keys[2], (2, 1024, 1280), dtype=jnp.float32))

    # 4) Non-128-multiple D kept full while S is tiled (lane-dense output).
    check(jax.random.normal(keys[3], (2, 2048, 520), dtype=jnp.float32))

    # 5) Narrow-dtype (bf16) path, full-dim blocks.
    check(jax.random.normal(keys[4], (2, 256, 384), dtype=jnp.bfloat16))

    print("KERNEL_OK")
</pallas_src>

<mosaic_0001>
module attributes {stable_mosaic.version = 11 : i64} {
  func.func @_transpose_kernel(%arg0: i32, %arg1: i32, %arg2: i32, %arg3: memref<1x8x32xf32, #tpu.memory_space<vmem>>, %arg4: memref<1x32x8xf32, #tpu.memory_space<vmem>>) attributes {dimension_semantics = [#tpu.dimension_semantics<parallel>, #tpu.dimension_semantics<parallel>, #tpu.dimension_semantics<parallel>], iteration_bounds = array<i64: 2, 1, 1>, scalar_prefetch = 0 : i64, scratch_operands = 0 : i64, tpu.core_type = #tpu.core_type<tc>, window_params = [{transform_indices = @transform_0, window_bounds = array<i64: 1, 8, 32>}, {transform_indices = @transform_1, window_bounds = array<i64: 1, 32, 8>}]} {
    %c0 = arith.constant 0 : index
    %c0_0 = arith.constant 0 : index
    %c0_1 = arith.constant 0 : index
    %0 = vector.load %arg3[%c0, %c0_0, %c0_1] : memref<1x8x32xf32, #tpu.memory_space<vmem>>, vector<1x8x32xf32>
    %1 = tpu.transpose %0, [0, 2, 1] : vector<1x8x32xf32> -> vector<1x32x8xf32>
    %c0_2 = arith.constant 0 : index
    %c0_3 = arith.constant 0 : index
    %c0_4 = arith.constant 0 : index
    %2 = vector.load %arg4[%c0_2, %c0_3, %c0_4] : memref<1x32x8xf32, #tpu.memory_space<vmem>>, vector<1x32x8xf32>
    tpu.vector_store %arg4[%c0_2, %c0_3, %c0_4], %1 {strides = array<i32>} : memref<1x32x8xf32, #tpu.memory_space<vmem>>, vector<1x32x8xf32>,
    return
  }
  func.func @transform_0(%arg0: i32, %arg1: i32, %arg2: i32) -> (i32, i32, i32) {
    %c0_i32 = arith.constant 0 : i32
    return %arg0, %arg2, %arg1 : i32, i32, i32
  }
  func.func @transform_1(%arg0: i32, %arg1: i32, %arg2: i32) -> (i32, i32, i32) {
    %c0_i32 = arith.constant 0 : i32
    return %arg0, %arg1, %arg2 : i32, i32, i32
  }
}

</mosaic_0001>

<bundles_post_ra>
// kernel: tpu_custom_call.1
= control target key start
LH: loop header
LB: loop body
LE: loop exit
PB: predicated region body
PF: predicated region fallthrough
CT: control target
= control target key end

     0   :  { %6 = vsyncpa [#allocation3], 0  ;;  %s610_s0 = inlined_call_operand.hbm [shape: f32[2,8,32], index: 0, kind: input, shape index: {}]   ;;  %s611_s1 = inlined_call_operand.vmem [shape: f32[2,32,8], index: 1, kind: output, shape index: {}]  }
   0x1   :  { %8 = vsyncpa [#allocation3 + $0x1], 0  ;;  %s485_s6 = smov 0   ;;  %s487_s7 = smov 0  }
   0x2   :  { %s489_s8 = smov 0   ;;  %s491_s9 = smov 0  }
   0x3   :  { %s493_s10 = smov 0   ;;  %s495_s11 = smov 0  }
   0x4 LB: > { %s323_s12 = sadd.s32 4294967295, %s472_s11   ;;  %s33_s13 = sadd.s32 1, %s468_s10  ;;  %s472_s11 = sphi %s495_s11, %s14_s11   ;;  %s468_s10 = sphi %s493_s10, %s621_s10   ;;  %s464_s9 = sphi %s491_s9, %s620_s9   ;;  %s460_s8 = sphi %s489_s8, %s619_s8   ;;  %s456_s7 = sphi %s487_s7, %s618_s7   ;;  %s452_s6 = sphi %s485_s6, %s617_s6  }
   0x5   : > { %p35_p0 = scmp.ge.s32.totalorder %s33_s13, 2  ;;  %s44_s14 = sadd.s32 1, %s460_s8 }
   0x6   : > { %p51_p1 = scmp.ne.s32.totalorder %s460_s8, %s456_s7  ;;  %p52_p2 = scmp.eq.s32.totalorder %s472_s11, 0 }
   0x7   : > { %s623_s13 = smov (%p35_p0, %s33_s13), 0  ;;  %p57_p4 = scmp.ne.s32.totalorder %s456_s7, %s452_s6 }
   0x8   : > { %p521_p3 = por %p52_p2, %p51_p1  ;;  %s37_s16 = ssub.s32 %s468_s10, %s623_s13 }
   0x9   : > { %p58_p5 = scmp.eq.s32.totalorder %s323_s12, 0  ;;  %p42_p6 = scmp.eq.s32.totalorder %s37_s16, 0 }
   0xa   : > { %p342_p8 = scmp.lt.s32.totalorder %s472_s11, 2  ;;  %s111_s19 = sand.u32 1, %s460_s8  }
   0xb   : > { %p528_p7 = por %p58_p5, %p57_p4  ;;  %s328_s20 = sshll.u32 %s468_s10, 7 }
   0xc   : > { %s534_s18 = scalar_select %p42_p6, %s460_s8, %s44_s14  }
   0xd   : > { %s327_s21 = sshll.u32 %s111_s19, 3  ;;  %s541_s24 = scalar_lea.hbm %s610_s0, %s328_s20 }
   0xe   : > { %s115_s25 = scalar_lea.vmem [#allocation2], %s327_s21  ;;  %p545_p9 = pnand %p342_p8, %p521_p3 }
   0xf   : > { %s124_s26 = sshll.u32 %s115_s25, 4  ;;  %s112_s28 = scalar_lea.sflag [#allocation3], %s111_s19  ;;  %s549_s26 = int_to_ptr.vmem [resolvable:$true] %s124_s26 }
  0x10   : > { %s392_s29 = scalar_lea.hbm %s541_s24, 128  ;;  %p394_p13 = pneg %p545_p9 }
  0x11   : > { %p393_p12 = scmp.ne.s32.totalorder %s541_s24, %s392_s29  ;;  %s397_s3 = scalar_lea.hbm %s610_s0, 256 }
  0x12   : > { %p398_p2 = scmp.lt.u32.totalorder %s541_s24, %s610_s0  ;;  %p399_p3 = scmp.lt.u32.totalorder %s397_s3, %s392_s29 }
  0x13   : > { %p395_p0 = pnand %p394_p13, %p393_p12  ;;  %p401_p5 = scmp.lt.u32.totalorder %s392_s29, %s541_s24 }
  0x14   : > { %p400_p4 = por %p399_p3, %p398_p2 }
  0x15   : > { %p396_p1 = pneg %p395_p0 }
  0x16   : > { %p402_p6 = por %p401_p5, %p400_p4 }
  0x18   : > { %p403_p8 = pnand %p402_p6, %p396_p1 }
  0x1a   : > { %406 = shalt.err (!%p403_p8)
}
  0x1b   : > { %s407_s6 = scalar_lea.vmem %s549_s26, 128  ;;  %s474_s12 = smov [#allocation2]  }
  0x1c   : > { %p408_p12 = scmp.ne.s32.totalorder %s549_s26, %s407_s6  ;;  %s412_s14 = sshll.u32 %s474_s12, 4  ;;  %s413_s14 = int_to_ptr.vmem [resolvable:$false] %s412_s14 }
  0x1d   : > { %s414_s15 = scalar_lea.vmem %s413_s14, 256  ;;  %p415_p11 = scmp.lt.s32.totalorder %s549_s26, %s413_s14 }
  0x1e   : > { %p410_p0 = pnand %p408_p12, %p394_p13  ;;  %p416_p2 = scmp.lt.s32.totalorder %s414_s15, %s407_s6 }
  0x20   : > { %p411_p10 = pneg %p410_p0  ;;  %p417_p3 = por %p416_p2, %p415_p11 }
  0x22   : > { %p418_p4 = pnand %p417_p3, %p411_p10 }
  0x24   : > { %421 = shalt.err (!%p418_p4)
}
  0x25   : > { %341 = dma.hbm_to_vmem [thread:$0]  (!%p545_p9), %s541_s24, 128, %s549_s26, %s112_s28  }
  0x26   : > { %p615_p1 = scmp.lt.s32.totalorder %s472_s11, 3  ;;  %p616_p5 = scmp.ge.s32.totalorder %s472_s11, 1 }
  0x28   : > { %p130_p13 = pnand %p616_p5, %p615_p1 }
  0x29   : > { %s135_s16 = sand.u32 (!%p130_p13), 1, %s456_s7  }
  0x2a   : > { %133 = sbr.rel (%p130_p13) target bundleno = 193 (0xc1), region = 24  ;;  %s330_s19 = sshll.u32 (!%p130_p13), %s135_s16, 3 }
  0x2b   : > { %s136_s20 = scalar_lea.sflag (!%p130_p13), [#allocation3], %s135_s16  ;;  %s139_s21 = scalar_lea.vmem (!%p130_p13), [#allocation2], %s330_s19 }
  0x31   : > { %447 = dma.done.wait (%p528_p7), %s136_s20, 128  }
  0x32   : > { %449 = vsyncadd (%p528_p7), %s136_s20, 4294967168  ;;  %v178_v0 = vld [vmem:[%s139_s21] sm:$0xff]  ;;  %p166_p9 = scmp.lt.s32.totalorder %s464_s9, 1  ;;  %vm211_vm0 = vcmask 64512  }
  0x33   : > { %179 = vxpose.xlu0.b32.start.end [1/1] (short) (narrow) %v178_v0, 32 }
  0x34   : > { %s625_s9 = smov (!%p166_p9, %s464_s9), 1 }
  0x35   : > { %s335_s22 = sshll.u32 %s625_s9, 5 }
  0x36   : > { %s176_s25 = scalar_lea.vmem %s611_s1, %s335_s22 }
  0xb3   : > { %v195_v1 = vpop.trf.xlu0 }
  0xb4   : > { %212 = vst.msk [vmem:[%s176_s25] sm:$0xff] %vm211_vm0, %v195_v1 }
  0xb7   : > { %v196_v2 = vpop.trf.xlu0 }
  0xb8   : > { %213 = vst.msk [vmem:[%s176_s25 + $0x8] sm:$0xff] %vm211_vm0, %v196_v2 }
  0xbb   : > { %v197_v3 = vpop.trf.xlu0 }
  0xbc   : > { %214 = vst.msk [vmem:[%s176_s25 + $0x10] sm:$0xff] %vm211_vm0, %v197_v3 }
  0xbf   : > { %v198_v4 = vpop.trf.xlu0 }
  0xc0   : > { %215 = vst.msk [vmem:[%s176_s25 + $0x18] sm:$0xff] %vm211_vm0, %v198_v4 }
  0xc1 PF: > { %s14_s11 = sadd.s32 1, %s472_s11   ;;  %s617_s6 = smov %s456_s7 }
  0xc2   : > { %p11_p7 = scmp.ge.s32.totalorder %s14_s11, 4   ;;  %s618_s7 = smov %s460_s8 }
  0xc3   : > { %s619_s8 = smov %s534_s18  ;;  %s620_s9 = smov %s468_s10 }
  0xc4   : > { %s621_s10 = smov %s623_s13  ;;  %13 = sbr.rel (!%p11_p7) target bundleno = 4 (0x4), region = 64 }
  0xcb   :  { %252 = vsyncpa [#allocation3], 1 }
  0xcc   :  { %254 = vsyncpa [#allocation3 + $0x1], 1 }

</bundles_post_ra>
